<compile_context>
chip_gen: v7x
topology: tpu7x:2x2x1
jax: 0.10.0
libtpu: 0.0.40
codegen_flags: <defaults>
</compile_context>

<pallas_src>
import jax
import jax.numpy as jnp
from jax.experimental import pallas as pl
from jax.experimental.pallas import tpu as pltpu

BERT_ENCODING_DIM = 768
BERT_LAYER_COUNT = 12 + 1  # 13


def _round_up(x, m):
    return ((x + m - 1) // m) * m


def _cls_mix_kernel(w_ref, hs_ref, out_ref):
    """Weighted sum over the layer axis for one (bt, H) CLS tile.

    w_ref  : SMEM (L,)       pre-softmaxed layer-mixing weights, f32
    hs_ref : VMEM (L, bt, H) CLS hidden states (layer, batch-tile, hidden)
    out_ref: VMEM (bt, H)    f32 weighted sum over layers
    """
    L = hs_ref.shape[0]
    # 13 broadcast-FMAs on the VPU; accumulate in f32, stay vreg-resident.
    acc = w_ref[0] * hs_ref[0].astype(jnp.float32)
    for l in range(1, L):
        acc = acc + w_ref[l] * hs_ref[l].astype(jnp.float32)
    out_ref[...] = acc.astype(out_ref.dtype)


def aspire_bienc_forward(hs_stacked, layer_weights):
    """hs_stacked   : (L, B, S, H) stacked BERT hidden states
                      (= jnp.stack(hidden_states, axis=0)), f32 or bf16.
       layer_weights: (1, L) raw SoftmaxMixLayers weight (bias=False).
       Returns cls_doc_reps: (B, H), always f32."""
    L, B, S, H = hs_stacked.shape
    assert L == BERT_LAYER_COUNT, L
    assert H % 128 == 0, H  # lane-dense full-H blocks

    # --- hoisted 13-way softmax over the layer-mix weights (SMEM scalar) ---
    w_norm = jax.nn.softmax(layer_weights.astype(jnp.float32).reshape(L))

    # --- CLS selection via BlockSpec: view as (L, B, S*H), read cols [0, H) ---
    # This reshape is a free bitcast (contiguous trailing dims); no HBM pass.
    hs_flat = hs_stacked.reshape(L, B, S * H)

    # --- tiling: batch rows on sublanes, full hidden axis (768) on lanes ---
    itemsize = jnp.dtype(hs_stacked.dtype).itemsize
    bt_cap = 256 if itemsize >= 4 else 512  # ~10 MiB/input buffer either way
    if B <= 8:
        bt = 8                              # single step: one DMA in, 13 FMAs, one DMA out
    else:
        # >= 2 parallel batch blocks (v7x dual TensorCore), capped for VMEM.
        bt = min(bt_cap, _round_up(pl.cdiv(B, 2), 8))
    grid = (pl.cdiv(B, bt),)                # partial edge block handled by Pallas masking

    out = pl.pallas_call(
        _cls_mix_kernel,
        out_shape=jax.ShapeDtypeStruct((B, H), jnp.float32),
        grid_spec=pltpu.PrefetchScalarGridSpec(
            num_scalar_prefetch=0,
            grid=grid,
            in_specs=[
                pl.BlockSpec(memory_space=pltpu.MemorySpace.SMEM),
                pl.BlockSpec((L, bt, H), lambda bi: (0, bi, 0)),
            ],
            out_specs=pl.BlockSpec((bt, H), lambda bi: (bi, 0)),
        ),
        compiler_params=pltpu.CompilerParams(
            dimension_semantics=("parallel",),
            vmem_limit_bytes=48 << 20,        # > v5e/v6e default scoped, < v7x physical
            allow_input_fusion=[False, True], # fuse the (bitcast) reshape into the operand
        ),
    )(w_norm, hs_flat)
    return out


def _reference(hs_stacked, layer_weights):
    """Pure-JAX reference matching the PyTorch semantics ((L, B, S, H) in)."""
    L = hs_stacked.shape[0]
    w = jax.nn.softmax(layer_weights.astype(jnp.float32).reshape(L))
    cls = hs_stacked[:, :, 0, :].astype(jnp.float32)  # (L, B, H)
    return jnp.einsum("lbh,l->bh", cls, w)


if __name__ == "__main__":
    B, S, H, L = 2, 8, BERT_ENCODING_DIM, BERT_LAYER_COUNT

    key = jax.random.PRNGKey(0)
    k_hs, k_w = jax.random.split(key)

    # Synthetic stacked BERT hidden states, (L, B, S, H) layout (H minor).
    hs_stacked = jax.random.normal(k_hs, (L, B, S, H), dtype=jnp.float32)
    # SoftmaxMixLayers: nn.Linear(in_features=13, out_features=1, bias=False)
    layer_weights = jax.random.normal(k_w, (1, L), dtype=jnp.float32) * 0.1

    out = jax.block_until_ready(aspire_bienc_forward(hs_stacked, layer_weights))
    ref = _reference(hs_stacked, layer_weights)
    assert out.shape == (B, H), out.shape
    assert out.dtype == jnp.float32, out.dtype
    assert jnp.allclose(out, ref, atol=1e-4, rtol=1e-4), "mismatch vs reference (f32)"

    # bf16 hidden states: half the HBM traffic, f32 accumulation, f32 output.
    hs_bf16 = hs_stacked.astype(jnp.bfloat16)
    out_bf16 = jax.block_until_ready(aspire_bienc_forward(hs_bf16, layer_weights))
    ref_bf16 = _reference(hs_bf16, layer_weights)
    assert out_bf16.dtype == jnp.float32
    assert jnp.allclose(out_bf16, ref_bf16, atol=1e-2, rtol=1e-2), "mismatch vs reference (bf16)"

    print("KERNEL_OK")
</pallas_src>

<mosaic_0001>
module attributes {stable_mosaic.version = 11 : i64} {
  func.func @_cls_mix_kernel(%arg0: i32, %arg1: memref<13xf32, #tpu.memory_space<smem>>, %arg2: memref<13x8x768xf32, #tpu.memory_space<vmem>>, %arg3: memref<8x768xf32, #tpu.memory_space<vmem>>) attributes {dimension_semantics = [#tpu.dimension_semantics<parallel>], iteration_bounds = array<i64: 1>, scalar_prefetch = 0 : i64, scratch_operands = 0 : i64, tpu.core_type = #tpu.core_type<tc>, window_params = [{transform_indices = @transform_0, window_bounds = array<i64: 13>}, {transform_indices = @transform_1, window_bounds = array<i64: 13, 8, 768>}, {transform_indices = @transform_2, window_bounds = array<i64: 8, 768>}]} {
    %c0 = arith.constant 0 : index
    %0 = memref.load %arg1[%c0] : memref<13xf32, #tpu.memory_space<smem>>
    %c0_0 = arith.constant 0 : index
    %c0_1 = arith.constant 0 : index
    %c0_2 = arith.constant 0 : index
    %1 = vector.load %arg2[%c0_0, %c0_1, %c0_2] : memref<13x8x768xf32, #tpu.memory_space<vmem>>, vector<1x8x768xf32>
    %2 = vector.shape_cast %1 : vector<1x8x768xf32> to vector<8x768xf32>
    %3 = vector.broadcast %0 : f32 to vector<8x768xf32>
    %4 = arith.mulf %3, %2 : vector<8x768xf32>
    %c1 = arith.constant 1 : index
    %5 = memref.load %arg1[%c1] : memref<13xf32, #tpu.memory_space<smem>>
    %c1_3 = arith.constant 1 : index
    %c0_4 = arith.constant 0 : index
    %c0_5 = arith.constant 0 : index
    %6 = vector.load %arg2[%c1_3, %c0_4, %c0_5] : memref<13x8x768xf32, #tpu.memory_space<vmem>>, vector<1x8x768xf32>
    %7 = vector.shape_cast %6 : vector<1x8x768xf32> to vector<8x768xf32>
    %8 = vector.broadcast %5 : f32 to vector<8x768xf32>
    %9 = arith.mulf %8, %7 : vector<8x768xf32>
    %10 = arith.addf %4, %9 : vector<8x768xf32>
    %c2 = arith.constant 2 : index
    %11 = memref.load %arg1[%c2] : memref<13xf32, #tpu.memory_space<smem>>
    %c2_6 = arith.constant 2 : index
    %c0_7 = arith.constant 0 : index
    %c0_8 = arith.constant 0 : index
    %12 = vector.load %arg2[%c2_6, %c0_7, %c0_8] : memref<13x8x768xf32, #tpu.memory_space<vmem>>, vector<1x8x768xf32>
    %13 = vector.shape_cast %12 : vector<1x8x768xf32> to vector<8x768xf32>
    %14 = vector.broadcast %11 : f32 to vector<8x768xf32>
    %15 = arith.mulf %14, %13 : vector<8x768xf32>
    %16 = arith.addf %10, %15 : vector<8x768xf32>
    %c3 = arith.constant 3 : index
    %17 = memref.load %arg1[%c3] : memref<13xf32, #tpu.memory_space<smem>>
    %c3_9 = arith.constant 3 : index
    %c0_10 = arith.constant 0 : index
    %c0_11 = arith.constant 0 : index
    %18 = vector.load %arg2[%c3_9, %c0_10, %c0_11] : memref<13x8x768xf32, #tpu.memory_space<vmem>>, vector<1x8x768xf32>
    %19 = vector.shape_cast %18 : vector<1x8x768xf32> to vector<8x768xf32>
    %20 = vector.broadcast %17 : f32 to vector<8x768xf32>
    %21 = arith.mulf %20, %19 : vector<8x768xf32>
    %22 = arith.addf %16, %21 : vector<8x768xf32>
    %c4 = arith.constant 4 : index
    %23 = memref.load %arg1[%c4] : memref<13xf32, #tpu.memory_space<smem>>
    %c4_12 = arith.constant 4 : index
    %c0_13 = arith.constant 0 : index
    %c0_14 = arith.constant 0 : index
    %24 = vector.load %arg2[%c4_12, %c0_13, %c0_14] : memref<13x8x768xf32, #tpu.memory_space<vmem>>, vector<1x8x768xf32>
    %25 = vector.shape_cast %24 : vector<1x8x768xf32> to vector<8x768xf32>
    %26 = vector.broadcast %23 : f32 to vector<8x768xf32>
    %27 = arith.mulf %26, %25 : vector<8x768xf32>
    %28 = arith.addf %22, %27 : vector<8x768xf32>
    %c5 = arith.constant 5 : index
    %29 = memref.load %arg1[%c5] : memref<13xf32, #tpu.memory_space<smem>>
    %c5_15 = arith.constant 5 : index
    %c0_16 = arith.constant 0 : index
    %c0_17 = arith.constant 0 : index
    %30 = vector.load %arg2[%c5_15, %c0_16, %c0_17] : memref<13x8x768xf32, #tpu.memory_space<vmem>>, vector<1x8x768xf32>
    %31 = vector.shape_cast %30 : vector<1x8x768xf32> to vector<8x768xf32>
    %32 = vector.broadcast %29 : f32 to vector<8x768xf32>
    %33 = arith.mulf %32, %31 : vector<8x768xf32>
    %34 = arith.addf %28, %33 : vector<8x768xf32>
    %c6 = arith.constant 6 : index
    %35 = memref.load %arg1[%c6] : memref<13xf32, #tpu.memory_space<smem>>
    %c6_18 = arith.constant 6 : index
    %c0_19 = arith.constant 0 : index
    %c0_20 = arith.constant 0 : index
    %36 = vector.load %arg2[%c6_18, %c0_19, %c0_20] : memref<13x8x768xf32, #tpu.memory_space<vmem>>, vector<1x8x768xf32>
    %37 = vector.shape_cast %36 : vector<1x8x768xf32> to vector<8x768xf32>
    %38 = vector.broadcast %35 : f32 to vector<8x768xf32>
    %39 = arith.mulf %38, %37 : vector<8x768xf32>
    %40 = arith.addf %34, %39 : vector<8x768xf32>
    %c7 = arith.constant 7 : index
    %41 = memref.load %arg1[%c7] : memref<13xf32, #tpu.memory_space<smem>>
    %c7_21 = arith.constant 7 : index
    %c0_22 = arith.constant 0 : index
    %c0_23 = arith.constant 0 : index
    %42 = vector.load %arg2[%c7_21, %c0_22, %c0_23] : memref<13x8x768xf32, #tpu.memory_space<vmem>>, vector<1x8x768xf32>
    %43 = vector.shape_cast %42 : vector<1x8x768xf32> to vector<8x768xf32>
    %44 = vector.broadcast %41 : f32 to vector<8x768xf32>
    %45 = arith.mulf %44, %43 : vector<8x768xf32>
    %46 = arith.addf %40, %45 : vector<8x768xf32>
    %c8 = arith.constant 8 : index
    %47 = memref.load %arg1[%c8] : memref<13xf32, #tpu.memory_space<smem>>
    %c8_24 = arith.constant 8 : index
    %c0_25 = arith.constant 0 : index
    %c0_26 = arith.constant 0 : index
    %48 = vector.load %arg2[%c8_24, %c0_25, %c0_26] : memref<13x8x768xf32, #tpu.memory_space<vmem>>, vector<1x8x768xf32>
    %49 = vector.shape_cast %48 : vector<1x8x768xf32> to vector<8x768xf32>
    %50 = vector.broadcast %47 : f32 to vector<8x768xf32>
    %51 = arith.mulf %50, %49 : vector<8x768xf32>
    %52 = arith.addf %46, %51 : vector<8x768xf32>
    %c9 = arith.constant 9 : index
    %53 = memref.load %arg1[%c9] : memref<13xf32, #tpu.memory_space<smem>>
    %c9_27 = arith.constant 9 : index
    %c0_28 = arith.constant 0 : index
    %c0_29 = arith.constant 0 : index
    %54 = vector.load %arg2[%c9_27, %c0_28, %c0_29] : memref<13x8x768xf32, #tpu.memory_space<vmem>>, vector<1x8x768xf32>
    %55 = vector.shape_cast %54 : vector<1x8x768xf32> to vector<8x768xf32>
    %56 = vector.broadcast %53 : f32 to vector<8x768xf32>
    %57 = arith.mulf %56, %55 : vector<8x768xf32>
    %58 = arith.addf %52, %57 : vector<8x768xf32>
    %c10 = arith.constant 10 : index
    %59 = memref.load %arg1[%c10] : memref<13xf32, #tpu.memory_space<smem>>
    %c10_30 = arith.constant 10 : index
    %c0_31 = arith.constant 0 : index
    %c0_32 = arith.constant 0 : index
    %60 = vector.load %arg2[%c10_30, %c0_31, %c0_32] : memref<13x8x768xf32, #tpu.memory_space<vmem>>, vector<1x8x768xf32>
    %61 = vector.shape_cast %60 : vector<1x8x768xf32> to vector<8x768xf32>
    %62 = vector.broadcast %59 : f32 to vector<8x768xf32>
    %63 = arith.mulf %62, %61 : vector<8x768xf32>
    %64 = arith.addf %58, %63 : vector<8x768xf32>
    %c11 = arith.constant 11 : index
    %65 = memref.load %arg1[%c11] : memref<13xf32, #tpu.memory_space<smem>>
    %c11_33 = arith.constant 11 : index
    %c0_34 = arith.constant 0 : index
    %c0_35 = arith.constant 0 : index
    %66 = vector.load %arg2[%c11_33, %c0_34, %c0_35] : memref<13x8x768xf32, #tpu.memory_space<vmem>>, vector<1x8x768xf32>
    %67 = vector.shape_cast %66 : vector<1x8x768xf32> to vector<8x768xf32>
    %68 = vector.broadcast %65 : f32 to vector<8x768xf32>
    %69 = arith.mulf %68, %67 : vector<8x768xf32>
    %70 = arith.addf %64, %69 : vector<8x768xf32>
    %c12 = arith.constant 12 : index
    %71 = memref.load %arg1[%c12] : memref<13xf32, #tpu.memory_space<smem>>
    %c12_36 = arith.constant 12 : index
    %c0_37 = arith.constant 0 : index
    %c0_38 = arith.constant 0 : index
    %72 = vector.load %arg2[%c12_36, %c0_37, %c0_38] : memref<13x8x768xf32, #tpu.memory_space<vmem>>, vector<1x8x768xf32>
    %73 = vector.shape_cast %72 : vector<1x8x768xf32> to vector<8x768xf32>
    %74 = vector.broadcast %71 : f32 to vector<8x768xf32>
    %75 = arith.mulf %74, %73 : vector<8x768xf32>
    %76 = arith.addf %70, %75 : vector<8x768xf32>
    %c0_39 = arith.constant 0 : index
    %c0_40 = arith.constant 0 : index
    %77 = vector.load %arg3[%c0_39, %c0_40] : memref<8x768xf32, #tpu.memory_space<vmem>>, vector<8x768xf32>
    tpu.vector_store %arg3[%c0_39, %c0_40], %76 {strides = array<i32>} : memref<8x768xf32, #tpu.memory_space<vmem>>, vector<8x768xf32>,
    return
  }
  func.func @transform_0(%arg0: i32) -> i32 {
    %c0_i32 = arith.constant 0 : i32
    %c0_i32_0 = arith.constant 0 : i32
    return %c0_i32 : i32
  }
  func.func @transform_1(%arg0: i32) -> (i32, i32, i32) {
    %c0_i32 = arith.constant 0 : i32
    %c0_i32_0 = arith.constant 0 : i32
    %c0_i32_1 = arith.constant 0 : i32
    return %c0_i32, %arg0, %c0_i32_0 : i32, i32, i32
  }
  func.func @transform_2(%arg0: i32) -> (i32, i32) {
    %c0_i32 = arith.constant 0 : i32
    %c0_i32_0 = arith.constant 0 : i32
    return %arg0, %c0_i32 : i32, i32
  }
}

</mosaic_0001>

<bundles_post_ra>
// kernel: tpu_custom_call.1
= control target key start
LH: loop header
LB: loop body
LE: loop exit
PB: predicated region body
PF: predicated region fallthrough
CT: control target
= control target key end

     0   :  { %7 = vsyncpa [#allocation5], 0  ;;  %s708_s0 = inlined_call_operand.hbm [shape: f32[13], index: 0, kind: input, shape index: {}]   ;;  %s709_s1 = inlined_call_operand.hbm [shape: f32[13,2,6144], index: 1, kind: input, shape index: {}]   ;;  %s710_s2 = inlined_call_operand.hbm [shape: f32[2,768], index: 2, kind: output, shape index: {}]  }
   0x1   :  { %8 = vsyncpa [#allocation3], 0 }
   0x2   :  { %9 = vsyncpa [#allocation4], 0  ;;  %s456_s11 = scalar_lea.hbm %s708_s0, 16 }
   0x3   :  { %p457_p0 = scmp.ne.s32.totalorder %s708_s0, %s456_s11  ;;  %p460_p1 = scmp.lt.u32.totalorder %s456_s11, %s708_s0 }
   0x5   :  { %p462_p2 = pnand %p460_p1, %p457_p0 }
   0x7   :  { %465 = shalt.err (!%p462_p2)
}
   0x8   :  { %s494_s16 = smov [#allocation2]  }
   0x9   :  { %17 = dma.hbm_to_smem %s708_s0, 16, %s494_s16, [#allocation5]  }
   0xa   :  { %22 = vsyncadd [#allocation3], 7488  ;;  %s27_s19 = sld [smem:[#allocation0]]   ;;  %s495_s20 = smov [#allocation6]  }
   0xb   :  { %s35_s21 = sshll.u32 %s495_s20, 4  ;;  %s496_s22 = smov 1536   ;;  %s36_s21 = int_to_ptr.vmem [resolvable:$true] %s35_s21 }
   0xc   :  { %42 = sst [smem:[#allocation9]] %s496_s22  ;;  %s497_s23 = smov 768  }
   0xd   :  { %44 = sst [smem:[#allocation9 + $0x1]] %s497_s23  ;;  %s498_s24 = smov 1  }
   0xe   :  { %46 = sst [smem:[#allocation9 + $0x2]] %s498_s24  ;;  %s499_s27 = smov 192  }
   0xf   :  { %48 = sst [smem:[#allocation9 + $0x3]] %s496_s22  ;;  %s500_s28 = smov 12  }
  0x10   :  { %s430_s25 = sshll.u32 %s27_s19, 26  ;;  %50 = sst [smem:[#allocation9 + $0x4]] %s499_s27 }
  0x11   :  { %s431_s26 = sadd.s32 134217728, %s430_s25  ;;  %52 = sst [smem:[#allocation9 + $0x5]] %s500_s28 }
  0x12   :  { %s501_s29 = smov [#allocation3]   ;;  %s502_s0 = smov [#allocation8]  }
  0x13   :  { %54 = dma.general %s709_s1, 2496, %s36_s21, %s501_s29, %s502_s0, [#allocation9], %s431_s26, 0  }
  0x14   :  { %488 = dma.done.wait [#allocation5], 16  }
  0x15   :  { %489 = vsyncadd [#allocation5], 4294967280 }
  0x16   :  { %490 = dma.done.wait [#allocation3], 9984  }
  0x17   :  { %491 = vsyncadd [#allocation3], 4294957312 }
  0x18   :  { %61 = sfence }
  0x19   :  { %s62_s4 = sld [smem:[#allocation2]]  ;;  %s432_s5 = sld [smem:[#allocation2 + $0x1]]  ;;  %v63_v0 = vld [vmem:[#allocation6] sm:$0xff]  ;;  %v82_v1 = vld [vmem:[#allocation6 + $0x30] sm:$0xff]  ;;  %v64_v15 = vld [vmem:[#allocation6 + $0x8] sm:$0xf] }
  0x1a   :  { %s433_s6 = sld [smem:[#allocation2 + $0x2]]  ;;  %s434_s7 = sld [smem:[#allocation2 + $0x3]]  ;;  %v109_v2 = vld [vmem:[#allocation6 + $0x60] sm:$0xff]  ;;  %v136_v5 = vld [vmem:[#allocation6 + $0x90] sm:$0xff]  ;;  %v83_v20 = vld [vmem:[#allocation6 + $0x38] sm:$0xf] }
  0x1b   :  { %s435_s8 = sld [smem:[#allocation2 + $0x4]]  ;;  %s436_s9 = sld [smem:[#allocation2 + $0x5]]  ;;  %v163_v11 = vld [vmem:[#allocation6 + $0xc0] sm:$0xff]  ;;  %v190_v16 = vld [vmem:[#allocation6 + $0xf0] sm:$0xff]  ;;  %v110_v21 = vld [vmem:[#allocation6 + $0x68] sm:$0xf] }
  0x1c   :  { %s437_s10 = sld [smem:[#allocation2 + $0x6]]  ;;  %s438_s11 = sld [smem:[#allocation2 + $0x7]]  ;;  %v217_v22 = vld [vmem:[#allocation6 + $0x120] sm:$0xff]  ;;  %v244_v24 = vld [vmem:[#allocation6 + $0x150] sm:$0xff]  ;;  %v137_v33 = vld [vmem:[#allocation6 + $0x98] sm:$0xf] }
  0x1d   :  { %s439_s12 = sld [smem:[#allocation2 + $0x8]]  ;;  %s536_s13 = sld [smem:[#allocation2 + $0x9]]  ;;  %v271_v26 = vld [vmem:[#allocation6 + $0x180] sm:$0xff]  ;;  %v298_v31 = vld [vmem:[#allocation6 + $0x1b0] sm:$0xff]  ;;  %v164_v45 = vld [vmem:[#allocation6 + $0xc8] sm:$0xf] }
  0x1e   :  { %s542_s1 = sld [smem:[#allocation2 + $0xa]]  ;;  %s544_s14 = sld [smem:[#allocation2 + $0xb]]  ;;  %v325_v34 = vld [vmem:[#allocation6 + $0x1e0] sm:$0xff]  ;;  %v352_v36 = vld [vmem:[#allocation6 + $0x210] sm:$0xff]  ;;  %v191_v53 = vld [vmem:[#allocation6 + $0xf8] sm:$0xf] }
  0x1f   :  { %v538_v3 = vstv %s62_s4  ;;  %v540_v4 = vstv %s432_s5  ;;  %s555_s15 = sld [smem:[#allocation2 + $0xc]]  ;;  %v65_v40 = vld [vmem:[#allocation6 + $0xc] sm:$0xff]  ;;  %v84_v46 = vld [vmem:[#allocation6 + $0x3c] sm:$0xff]  ;;  %v218_v54 = vld [vmem:[#allocation6 + $0x128] sm:$0xf] }
  0x20   :  { %v72_v6 = vmul.f32 %v538_v3, %v63_v0  ;;  %v91_v7 = vmul.f32 %v540_v4, %v82_v1  ;;  %v548_v8 = vstv %s433_s6  ;;  %v550_v9 = vstv %s434_s7  ;;  %v111_v47 = vld [vmem:[#allocation6 + $0x6c] sm:$0xff]  ;;  %v379_v49 = vld [vmem:[#allocation6 + $0x240] sm:$0xff]  ;;  %v245_v58 = vld [vmem:[#allocation6 + $0x158] sm:$0xf] }
  0x21   :  { %v118_v10 = vmul.f32 %v548_v8, %v109_v2  ;;  %v553_v12 = vstv %s435_s8  ;;  %v145_v14 = vmul.f32 %v550_v9, %v136_v5  ;;  %v558_v17 = vstv %s436_s9  ;;  %v138_v60 = vld [vmem:[#allocation6 + $0x9c] sm:$0xff]  ;;  %v272_v63 = vld [vmem:[#allocation6 + $0x188] sm:$0xf]  ;;  %v299_v0 = vld [vmem:[#allocation6 + $0x1b8] sm:$0xf] }
  0x22   :  { %v99_v13 = vadd.f32 %v91_v7, %v72_v6  ;;  %v172_v19 = vmul.f32 %v553_v12, %v163_v11  ;;  %v561_v23 = vstv %s437_s10  ;;  %v563_v25 = vstv %s438_s11  ;;  %v326_v1 = vld [vmem:[#allocation6 + $0x1e8] sm:$0xf] }
  0x23   :  { %v565_v27 = vstv %s439_s12  ;;  %v73_v28 = vmul.f32 %v538_v3, %v64_v15  ;;  %v199_v30 = vmul.f32 %v558_v17, %v190_v16  ;;  %v570_v32 = vstv %s536_s13 }
  0x24   :  { %v126_v18 = vadd.f32 %v118_v10, %v99_v13  ;;  %v573_v35 = vstv %s542_s1  ;;  %v576_v37 = vstv %s544_s14  ;;  %v92_v38 = vmul.f32 %v540_v4, %v83_v20  ;;  %v165_v13 = vld [vmem:[#allocation6 + $0xcc] sm:$0xff] }
  0x25   :  { %v119_v39 = vmul.f32 %v548_v8, %v110_v21  ;;  %v226_v42 = vmul.f32 %v561_v23, %v217_v22  ;;  %v253_v43 = vmul.f32 %v563_v25, %v244_v24  ;;  %v280_v44 = vmul.f32 %v565_v27, %v271_v26  ;;  %v85_v21 = vld [vmem:[#allocation6 + $0x44] sm:$0xf]  ;;  %v112_v22 = vld [vmem:[#allocation6 + $0x74] sm:$0xf] }
  0x26   :  { %v153_v29 = vadd.f32 %v145_v14, %v126_v18  ;;  %v307_v48 = vmul.f32 %v570_v32, %v298_v31  ;;  %v585_v50 = vstv %s555_s15  ;;  %v100_v51 = vadd.f32 %v92_v38, %v73_v28  ;;  %v66_v14 = vld [vmem:[#allocation6 + $0x14] sm:$0xf]  ;;  %v353_v18 = vld [vmem:[#allocation6 + $0x218] sm:$0xf]  ;;  %v192_v31 = vld [vmem:[#allocation6 + $0xfc] sm:$0xff] }
  0x27   :  { %v146_v52 = vmul.f32 %v550_v9, %v137_v33  ;;  %v334_v56 = vmul.f32 %v573_v35, %v325_v34  ;;  %v590_v57 = vmul.f32 %v576_v37, %v352_v36  ;;  %v74_v59 = vmul.f32 %v538_v3, %v65_v40  ;;  %v219_v38 = vld [vmem:[#allocation6 + $0x12c] sm:$0xff]  ;;  %v139_v40 = vld [vmem:[#allocation6 + $0xa4] sm:$0xf] }
  0x28   :  { %v180_v41 = vadd.f32 %v172_v19, %v153_v29  ;;  %v127_v61 = vadd.f32 %v119_v39, %v100_v51  ;;  %v173_v62 = vmul.f32 %v553_v12, %v164_v45  ;;  %v93_v2 = vmul.f32 %v540_v4, %v84_v46  ;;  %v273_v45 = vld [vmem:[#allocation6 + $0x18c] sm:$0xff] }
  0x29   :  { %v120_v5 = vmul.f32 %v548_v8, %v111_v47  ;;  %v597_v7 = vmul.f32 %v585_v50, %v379_v49  ;;  %v200_v10 = vmul.f32 %v558_v17, %v191_v53  ;;  %v227_v11 = vmul.f32 %v561_v23, %v218_v54  ;;  %v300_v54 = vld [vmem:[#allocation6 + $0x1bc] sm:$0xff] }
  0x2a   :  { %v207_v55 = vadd.f32 %v199_v30, %v180_v41  ;;  %v154_v15 = vadd.f32 %v146_v52, %v127_v61  ;;  %v254_v16 = vmul.f32 %v563_v25, %v245_v58  ;;  %v101_v19 = vadd.f32 %v93_v2, %v74_v59  ;;  %v380_v30 = vld [vmem:[#allocation6 + $0x248] sm:$0xf]  ;;  %v193_v61 = vld [vmem:[#allocation6 + $0x104] sm:$0xf] }
  0x2b   :  { %v147_v20 = vmul.f32 %v550_v9, %v138_v60  ;;  %v281_v26 = vmul.f32 %v565_v27, %v272_v63  ;;  %v605_v28 = vmul.f32 %v570_v32, %v299_v0  ;;  %v608_v29 = vmul.f32 %v573_v35, %v326_v1 }
  0x2c   :  { %v234_v6 = vadd.f32 %v226_v42, %v207_v55  ;;  %v181_v33 = vadd.f32 %v173_v62, %v154_v15  ;;  %v128_v34 = vadd.f32 %v120_v5, %v101_v19  ;;  %v174_v36 = vmul.f32 %v553_v12, %v165_v13  ;;  %v166_v55 = vld [vmem:[#allocation6 + $0xd4] sm:$0xf]  ;;  %v67_v62 = vld [vmem:[#allocation6 + $0x18] sm:$0xff]  ;;  %v86_v5 = vld [vmem:[#allocation6 + $0x48] sm:$0xff] }
  0x2d   :  { %v75_v39 = vmul.f32 %v538_v3, %v66_v14  ;;  %v613_v42 = vmul.f32 %v576_v37, %v353_v18  ;;  %v94_v46 = vmul.f32 %v540_v4, %v85_v21  ;;  %v121_v47 = vmul.f32 %v548_v8, %v112_v22  ;;  %v327_v14 = vld [vmem:[#allocation6 + $0x1ec] sm:$0xff]  ;;  %v220_v18 = vld [vmem:[#allocation6 + $0x134] sm:$0xf] }
  0x2e   :  { %v261_v24 = vadd.f32 %v253_v43, %v234_v6  ;;  %v246_v43 = vld [vmem:[#allocation6 + $0x15c] sm:$0xff]  ;;  %v208_v49 = vadd.f32 %v200_v10, %v181_v33  ;;  %v618_v51 = vmul.f32 %v585_v50, %v380_v30  ;;  %v155_v52 = vadd.f32 %v147_v20, %v128_v34  ;;  %v140_v22 = vld [vmem:[#allocation6 + $0xa8] sm:$0xff] }
  0x2f   :  { %v201_v53 = vmul.f32 %v558_v17, %v192_v31  ;;  %v102_v59 = vadd.f32 %v94_v46, %v75_v39  ;;  %v148_v60 = vmul.f32 %v550_v9, %v139_v40  ;;  %v255_v1 = vmul.f32 %v563_v25, %v246_v43  ;;  %v113_v6 = vld [vmem:[#allocation6 + $0x78] sm:$0xff]  ;;  %v381_v31 = vld [vmem:[#allocation6 + $0x24c] sm:$0xff]  ;;  %v247_v40 = vld [vmem:[#allocation6 + $0x164] sm:$0xf] }
  0x30   :  { %v288_v41 = vadd.f32 %v280_v44, %v261_v24  ;;  %v228_v44 = vmul.f32 %v561_v23, %v219_v38  ;;  %v235_v63 = vadd.f32 %v227_v11, %v208_v49  ;;  %v182_v0 = vadd.f32 %v174_v36, %v155_v52  ;;  %v354_v30 = vld [vmem:[#allocation6 + $0x21c] sm:$0xff]  ;;  %v274_v46 = vld [vmem:[#allocation6 + $0x194] sm:$0xf] }
  0x31   :  { %v282_v2 = vmul.f32 %v565_v27, %v273_v45  ;;  %v309_v13 = vmul.f32 %v570_v32, %v300_v54  ;;  %v175_v15 = vmul.f32 %v553_v12, %v166_v55  ;;  %v202_v21 = vmul.f32 %v558_v17, %v193_v61  ;;  %v194_v55 = vld [vmem:[#allocation6 + $0x108] sm:$0xff]  ;;  %v87_v61 = vld [vmem:[#allocation6 + $0x50] sm:$0xf] }
  0x32   :  { %v315_v58 = vadd.f32 %v307_v48, %v288_v41  ;;  %v129_v48 = vadd.f32 %v121_v47, %v102_v59  ;;  %v262_v19 = vadd.f32 %v254_v16, %v235_v63  ;;  %v209_v20 = vadd.f32 %v201_v53, %v182_v0  ;;  %v167_v41 = vld [vmem:[#allocation6 + $0xd8] sm:$0xff] }
  0x33   :  { %v76_v11 = vmul.f32 %v538_v3, %v67_v62  ;;  %v122_v34 = vmul.f32 %v548_v8, %v113_v6  ;;  %v336_v39 = vmul.f32 %v573_v35, %v327_v14  ;;  %v229_v16 = vmul.f32 %v561_v23, %v220_v18  ;;  %v114_v62 = vld [vmem:[#allocation6 + $0x80] sm:$0xf]  ;;  %v221_v6 = vld [vmem:[#allocation6 + $0x138] sm:$0xff]  ;;  %v141_v18 = vld [vmem:[#allocation6 + $0xb0] sm:$0xf] }
  0x34   :  { %v342_v10 = vadd.f32 %v334_v56, %v315_v58  ;;  %v156_v33 = vadd.f32 %v148_v60, %v129_v48  ;;  %v95_v56 = vmul.f32 %v540_v4, %v86_v5  ;;  %v289_v36 = vadd.f32 %v281_v26, %v262_v19  ;;  %v68_v58 = vld [vmem:[#allocation6 + $0x20] sm:$0xf]  ;;  %v328_v5 = vld [vmem:[#allocation6 + $0x1f4] sm:$0xf] }
  0x35   :  { %v236_v38 = vadd.f32 %v228_v44, %v209_v20  ;;  %v149_v49 = vmul.f32 %v550_v9, %v140_v22  ;;  %v363_v26 = vmul.f32 %v576_v37, %v354_v30  ;;  %v390_v54 = vmul.f32 %v585_v50, %v381_v31  ;;  %v382_v30 = vld [vmem:[#allocation6 + $0x254] sm:$0xf] }
  0x36   :  { %v369_v24 = vadd.f32 %v590_v57, %v342_v10  ;;  %v183_v45 = vadd.f32 %v175_v15, %v156_v33  ;;  %v301_v57 = vld [vmem:[#allocation6 + $0x1c4] sm:$0xf]  ;;  %v103_v47 = vadd.f32 %v95_v56, %v76_v11  ;;  %v316_v52 = vadd.f32 %v605_v28, %v289_v36  ;;  %v248_v11 = vld [vmem:[#allocation6 + $0x168] sm:$0xff]  ;;  %v168_v56 = vld [vmem:[#allocation6 + $0xe0] sm:$0xf] }
  0x37   :  { %v263_v53 = vadd.f32 %v255_v1, %v236_v38  ;;  %v256_v59 = vmul.f32 %v563_v25, %v247_v40  ;;  %v176_v60 = vmul.f32 %v553_v12, %v167_v41  ;;  %v283_v28 = vmul.f32 %v565_v27, %v274_v46  ;;  %v275_v38 = vld [vmem:[#allocation6 + $0x198] sm:$0xff]  ;;  %v195_v46 = vld [vmem:[#allocation6 + $0x110] sm:$0xf] }
  0x38   :  { %v396_v43 = vadd.f32 %v597_v7, %v369_v24  ;;  %v210_v44 = vadd.f32 %v202_v21, %v183_v45  ;;  %v130_v7 = vadd.f32 %v122_v34, %v103_v47  ;;  %v343_v63 = vadd.f32 %v608_v29, %v316_v52  ;;  %v355_v21 = vld [vmem:[#allocation6 + $0x224] sm:$0xf] }
  0x39   :  { %v290_v0 = vadd.f32 %v282_v2, %v263_v53  ;;  %v310_v1 = vmul.f32 %v570_v32, %v301_v57  ;;  %v203_v48 = vmul.f32 %v558_v17, %v194_v55  ;;  %v77_v15 = vmul.f32 %v538_v3, %v68_v58  ;;  %v69_v57 = vld [vmem:[#allocation6 + $0x24] sm:$0xff] }
  0x3a   :  { %404 = vst [vmem:[#allocation7] sm:$0xff] %v396_v43  ;;  %v237_v10 = vadd.f32 %v229_v16, %v210_v44  ;;  %v157_v14 = vadd.f32 %v149_v49, %v130_v7  ;;  %v370_v19 = vadd.f32 %v613_v42, %v343_v63  ;;  %v96_v29 = vmul.f32 %v540_v4, %v87_v61  ;;  %v302_v42 = vld [vmem:[#allocation6 + $0x1c8] sm:$0xff]  ;;  %v329_v7 = vld [vmem:[#allocation6 + $0x1f8] sm:$0xff] }
  0x3b   :  { %v317_v20 = vadd.f32 %v309_v13, %v290_v0  ;;  %v123_v2 = vmul.f32 %v548_v8, %v114_v62  ;;  %v337_v24 = vmul.f32 %v573_v35, %v328_v5  ;;  %v230_v33 = vmul.f32 %v561_v23, %v221_v6  ;;  %v115_v53 = vld [vmem:[#allocation6 + $0x84] sm:$0xff]  ;;  %v142_v0 = vld [vmem:[#allocation6 + $0xb4] sm:$0xff] }
  0x3c   :  { %v264_v22 = vadd.f32 %v256_v59, %v237_v10  ;;  %v184_v31 = vadd.f32 %v176_v60, %v157_v14  ;;  %v397_v34 = vadd.f32 %v618_v51, %v370_v19  ;;  %v104_v13 = vadd.f32 %v96_v29, %v77_v15  ;;  %v222_v60 = vld [vmem:[#allocation6 + $0x140] sm:$0xf]  ;;  %v356_v6 = vld [vmem:[#allocation6 + $0x228] sm:$0xff]  ;;  %v383_v10 = vld [vmem:[#allocation6 + $0x258] sm:$0xff] }
  0x3d   :  { %v344_v36 = vadd.f32 %v336_v39, %v317_v20  ;;  %v150_v16 = vmul.f32 %v550_v9, %v141_v18  ;;  %v364_v41 = vmul.f32 %v576_v37, %v355_v21  ;;  %v257_v45 = vmul.f32 %v563_v25, %v248_v11  ;;  %v88_v39 = vld [vmem:[#allocation6 + $0x54] sm:$0xff]  ;;  %v249_v14 = vld [vmem:[#allocation6 + $0x170] sm:$0xf]  ;;  %v169_v19 = vld [vmem:[#allocation6 + $0xe4] sm:$0xff] }
  0x3e   :  { %v291_v40 = vadd.f32 %v283_v28, %v264_v22  ;;  %v211_v43 = vadd.f32 %v203_v48, %v184_v31  ;;  %405 = vst [vmem:[#allocation7 + $0x8] sm:$0xf] %v397_v34  ;;  %v391_v49 = vmul.f32 %v585_v50, %v382_v30  ;;  %v131_v52 = vadd.f32 %v123_v2, %v104_v13  ;;  %v276_v11 = vld [vmem:[#allocation6 + $0x1a0] sm:$0xf]  ;;  %v196_v22 = vld [vmem:[#allocation6 + $0x114] sm:$0xff] }
  0x3f   :  { %v371_v47 = vadd.f32 %v363_v26, %v344_v36  ;;  %v177_v51 = vmul.f32 %v553_v12, %v168_v56  ;;  %v284_v44 = vmul.f32 %v565_v27, %v275_v38  ;;  %v311_v59 = vmul.f32 %v570_v32, %v302_v42  ;;  %v89_v34 = vld [vmem:[#allocation6 + $0x5c] sm:$0xf]  ;;  %v116_v36 = vld [vmem:[#allocation6 + $0x8c] sm:$0xf]  ;;  %v303_v13 = vld [vmem:[#allocation6 + $0x1d0] sm:$0xf] }
  0x40   :  { %v318_v55 = vadd.f32 %v310_v1, %v291_v40  ;;  %v238_v58 = vadd.f32 %v230_v33, %v211_v43  ;;  %v158_v62 = vadd.f32 %v150_v16, %v131_v52  ;;  %v204_v63 = vmul.f32 %v558_v17, %v195_v46 }
  0x41   :  { %v398_v61 = vadd.f32 %v390_v54, %v371_v47  ;;  %v78_v26 = vmul.f32 %v538_v3, %v69_v57  ;;  %v97_v1 = vmul.f32 %v540_v4, %v88_v39  ;;  %v124_v48 = vmul.f32 %v548_v8, %v115_v53  ;;  %v143_v47 = vld [vmem:[#allocation6 + $0xbc] sm:$0xf]  ;;  %v250_v53 = vld [vmem:[#allocation6 + $0x174] sm:$0xff] }
  0x42   :  { %v345_v28 = vadd.f32 %v337_v24, %v318_v55  ;;  %v265_v5 = vadd.f32 %v257_v45, %v238_v58  ;;  %v338_v15 = vmul.f32 %v573_v35, %v329_v7  ;;  %v185_v18 = vadd.f32 %v177_v51, %v158_v62  ;;  %v70_v24 = vld [vmem:[#allocation6 + $0x2c] sm:$0xf]  ;;  %v330_v51 = vld [vmem:[#allocation6 + $0x200] sm:$0xf] }
  0x43   :  { %406 = vst [vmem:[#allocation7 + $0xc] sm:$0xff] %v398_v61  ;;  %v231_v54 = vmul.f32 %v561_v23, %v222_v60  ;;  %v105_v29 = vadd.f32 %v97_v1, %v78_v26  ;;  %v151_v2 = vmul.f32 %v550_v9, %v142_v0  ;;  %v365_v30 = vmul.f32 %v576_v37, %v356_v6  ;;  %v170_v7 = vld [vmem:[#allocation6 + $0xec] sm:$0xf]  ;;  %v357_v61 = vld [vmem:[#allocation6 + $0x230] sm:$0xf] }
  0x44   :  { %v372_v20 = vadd.f32 %v364_v41, %v345_v28  ;;  %v292_v21 = vadd.f32 %v284_v44, %v265_v5  ;;  %v392_v31 = vmul.f32 %v585_v50, %v383_v10  ;;  %v212_v33 = vadd.f32 %v204_v63, %v185_v18  ;;  %v223_v41 = vld [vmem:[#allocation6 + $0x144] sm:$0xff]  ;;  %v197_v5 = vld [vmem:[#allocation6 + $0x11c] sm:$0xf]  ;;  %v384_v6 = vld [vmem:[#allocation6 + $0x260] sm:$0xf] }
  0x45   :  { %v258_v56 = vmul.f32 %v563_v25, %v249_v14  ;;  %v132_v16 = vadd.f32 %v124_v48, %v105_v29  ;;  %v178_v40 = vmul.f32 %v553_v12, %v169_v19  ;;  %v285_v45 = vmul.f32 %v565_v27, %v276_v11  ;;  %v304_v18 = vld [vmem:[#allocation6 + $0x1d4] sm:$0xff] }
  0x46   :  { %v399_v38 = vadd.f32 %v391_v49, %v372_v20  ;;  %v319_v42 = vadd.f32 %v311_v59, %v292_v21  ;;  %v239_v43 = vadd.f32 %v231_v54, %v212_v33  ;;  %v205_v46 = vmul.f32 %v558_v17, %v196_v22  ;;  %v224_v54 = vld [vmem:[#allocation6 + $0x14c] sm:$0xf]  ;;  %v251_v22 = vld [vmem:[#allocation6 + $0x17c] sm:$0xf] }
  0x47   :  { %v79_v57 = vmul.f32 %v538_v3, %v70_v24  ;;  %v159_v39 = vadd.f32 %v151_v2, %v132_v16  ;;  %v98_v49 = vmul.f32 %v540_v4, %v89_v34  ;;  %v125_v55 = vmul.f32 %v548_v8, %v116_v36  ;;  %v277_v4 = vld [vmem:[#allocation6 + $0x1a4] sm:$0xff]  ;;  %v278_v34 = vld [vmem:[#allocation6 + $0x1ac] sm:$0xf] }
  0x48   :  { %407 = vst [vmem:[#allocation7 + $0x14] sm:$0xf] %v399_v38  ;;  %v346_v52 = vadd.f32 %v338_v15, %v319_v42  ;;  %v266_v58 = vadd.f32 %v258_v56, %v239_v43  ;;  %v312_v44 = vmul.f32 %v570_v32, %v303_v13  ;;  %v232_v59 = vmul.f32 %v561_v23, %v223_v41  ;;  %v331_v2 = vld [vmem:[#allocation6 + $0x204] sm:$0xff]  ;;  %v358_v56 = vld [vmem:[#allocation6 + $0x234] sm:$0xff] }
  0x49   :  { %v186_v62 = vadd.f32 %v178_v40, %v159_v39  ;;  %v106_v3 = vadd.f32 %v98_v49, %v79_v57  ;;  %v152_v63 = vmul.f32 %v550_v9, %v143_v47  ;;  %v339_v0 = vmul.f32 %v573_v35, %v330_v51  ;;  %v385_v16 = vld [vmem:[#allocation6 + $0x264] sm:$0xff]  ;;  %v305_v40 = vld [vmem:[#allocation6 + $0x1dc] sm:$0xf] }
  0x4a   :  { %v373_v60 = vadd.f32 %v365_v30, %v346_v52  ;;  %v293_v26 = vadd.f32 %v285_v45, %v266_v58  ;;  %v259_v28 = vmul.f32 %v563_v25, %v250_v53  ;;  %v179_v1 = vmul.f32 %v553_v12, %v170_v7  ;;  %v359_v39 = vld [vmem:[#allocation6 + $0x23c] sm:$0xf] }
  0x4b   :  { %v213_v10 = vadd.f32 %v205_v46, %v186_v62  ;;  %v133_v14 = vadd.f32 %v125_v55, %v106_v3  ;;  %v366_v15 = vmul.f32 %v576_v37, %v357_v61  ;;  %v286_v19 = vmul.f32 %v565_v27, %v277_v4  ;;  %v386_v55 = vld [vmem:[#allocation6 + $0x26c] sm:$0xf] }
  0x4c   :  { %v400_v8 = vadd.f32 %v392_v31, %v373_v60  ;;  %v320_v48 = vadd.f32 %v312_v44, %v293_v26  ;;  %v206_v21 = vmul.f32 %v558_v17, %v197_v5  ;;  %v393_v29 = vmul.f32 %v585_v50, %v384_v6 }
  0x4d   :  { %v240_v9 = vadd.f32 %v232_v59, %v213_v10  ;;  %v160_v20 = vadd.f32 %v152_v63, %v133_v14  ;;  %v313_v12 = vmul.f32 %v570_v32, %v304_v18  ;;  %v233_v31 = vmul.f32 %v561_v23, %v224_v54  ;;  %v332_v23 = vld [vmem:[#allocation6 + $0x20c] sm:$0xf] }
  0x4e   :  { %408 = vst [vmem:[#allocation7 + $0x18] sm:$0xff] %v400_v8  ;;  %v347_v11 = vadd.f32 %v339_v0, %v320_v48  ;;  %v340_v38 = vmul.f32 %v573_v35, %v331_v2  ;;  %v260_v17 = vmul.f32 %v563_v25, %v251_v22  ;;  %v367_v43 = vmul.f32 %v576_v37, %v358_v56 }
  0x4f   :  { %v267_v24 = vadd.f32 %v259_v28, %v240_v9  ;;  %v187_v30 = vadd.f32 %v179_v1, %v160_v20  ;;  %v287_v46 = vmul.f32 %v565_v27, %v278_v34  ;;  %v394_v47 = vmul.f32 %v585_v50, %v385_v16 }
  0x50   :  { %v374_v33 = vadd.f32 %v366_v15, %v347_v11  ;;  %v314_v51 = vmul.f32 %v570_v32, %v305_v40  ;;  %v341_v49 = vmul.f32 %v573_v35, %v332_v23  ;;  %v368_v59 = vmul.f32 %v576_v37, %v359_v39 }
  0x51   :  { %v294_v36 = vadd.f32 %v286_v19, %v267_v24  ;;  %v214_v42 = vadd.f32 %v206_v21, %v187_v30  ;;  %v395_v7 = vmul.f32 %v585_v50, %v386_v55 }
  0x52   :  { %v401_v13 = vadd.f32 %v393_v29, %v374_v33 }
  0x53   :  { %v321_v41 = vadd.f32 %v313_v12, %v294_v36  ;;  %v241_v45 = vadd.f32 %v233_v31, %v214_v42 }
  0x54   :  { %409 = vst [vmem:[#allocation7 + $0x20] sm:$0xf] %v401_v13 }
  0x55   :  { %v348_v57 = vadd.f32 %v340_v38, %v321_v41  ;;  %v268_v52 = vadd.f32 %v260_v17, %v241_v45 }
  0x57   :  { %v375_v53 = vadd.f32 %v367_v43, %v348_v57  ;;  %v295_v25 = vadd.f32 %v287_v46, %v268_v52 }
  0x59   :  { %v402_v58 = vadd.f32 %v394_v47, %v375_v53  ;;  %v322_v44 = vadd.f32 %v314_v51, %v295_v25 }
  0x5b   :  { %410 = vst [vmem:[#allocation7 + $0x24] sm:$0xff] %v402_v58  ;;  %v349_v27 = vadd.f32 %v341_v49, %v322_v44 }
  0x5d   :  { %v376_v60 = vadd.f32 %v368_v59, %v349_v27 }
  0x5f   :  { %v403_v61 = vadd.f32 %v395_v7, %v376_v60 }
  0x61   :  { %411 = vst [vmem:[#allocation7 + $0x2c] sm:$0xf] %v403_v61 }
  0x62   :  { %416 = vsyncadd [#allocation4], 576  ;;  %s503_s16 = smov [#allocation7]  }
  0x63   :  { %s417_s17 = sshll.u32 %s503_s16, 4  ;;  %s418_s17 = int_to_ptr.vmem [resolvable:$true] %s417_s17 }
  0x64   :  { %s466_s18 = scalar_lea.vmem %s418_s17, 192  ;;  %s470_s19 = scalar_lea.vmem %s418_s17, 768 }
  0x65   :  { %p467_p3 = scmp.ne.s32.totalorder %s418_s17, %s466_s18  ;;  %p471_p4 = scmp.lt.s32.totalorder %s418_s17, %s418_s17 }
  0x66   :  { %p472_p5 = scmp.lt.s32.totalorder %s470_s19, %s466_s18 }
  0x68   :  { %p473_p6 = por %p472_p5, %p471_p4 }
  0x6a   :  { %p474_p7 = pnand %p473_p6, %p467_p3 }
  0x6c   :  { %477 = shalt.err (!%p474_p7)
}
  0x6d   :  { %s478_s22 = scalar_lea.hbm %s710_s2, 192 }
  0x6e   :  { %p479_p8 = scmp.ne.s32.totalorder %s710_s2, %s478_s22  ;;  %p482_p9 = scmp.lt.u32.totalorder %s478_s22, %s710_s2 }
  0x70   :  { %p484_p10 = pnand %p482_p9, %p479_p8 }
  0x72   :  { %487 = shalt.err (!%p484_p10)
}
  0x73   :  { %s504_s27 = smov 192   ;;  %s505_s28 = smov 12  }
  0x74   :  { %423 = dma.vmem_to_hbm [thread:$0]  %s418_s17, 192, %s710_s2, [#allocation4], %s504_s27, %s504_s27, %s505_s28  }
  0x75   :  { %492 = dma.done.wait [#allocation4], 768  }
  0x76   :  { %493 = vsyncadd [#allocation4], 4294966528 }
  0x77   :  { %427 = vsyncpa [#allocation3], 1 }
  0x78   :  { %428 = vsyncpa [#allocation4], 1 }
  0x79   :  { %429 = vsyncpa [#allocation5], 1 }

</bundles_post_ra>
